<compile_context>
chip_gen: v7x
topology: tpu7x:2x2x1
jax: 0.10.0
libtpu: 0.0.40
codegen_flags: <defaults>
</compile_context>

<pallas_src>
import jax
import jax.numpy as jnp
from jax.experimental import pallas as pl
from jax.experimental.pallas import tpu as pltpu


_TARGET_BLOCK_BYTES = 2 * 1024 * 1024  # ~2 MiB/block: on the HBM-roofline plateau,
                                       # safe double-buffered on every TPU generation
_ROW_ALIGN = 32                        # row multiple valid for any dtype's (8/16/32,128) tiling


def _h_swish_kernel(x_ref, o_ref):
    # h_sigmoid(x) = relu6(x + 3) / 6 ; h_swish(x) = x * h_sigmoid(x)
    # Ragged final blocks contain garbage lanes from the padded read, but their
    # writes are masked by Pallas -> safe for a pure elementwise op (NOT for reductions).
    x = x_ref[...]
    o_ref[...] = x * jnp.clip(x + 3.0, 0.0, 6.0) * (1.0 / 6.0)


def h_swish(x):
    """Elementwise hard-swish. Accepts any shape / layout (op is layout-agnostic)."""
    orig_shape = x.shape
    total = x.size
    if total == 0:
        return x

    dtype = x.dtype
    itemsize = jnp.dtype(dtype).itemsize
    xf = x.reshape(-1)  # flat view; reshape of a contiguous array is free in XLA

    compiler_params = pltpu.CompilerParams(dimension_semantics=("parallel",))

    # Prefer a lane-dense 2-D slab (rows, lanes) with lanes a multiple of 128 so
    # every vector store is a full unmasked vst.
    lanes = next((c for c in (1024, 512, 256, 128) if total % c == 0), None)

    if lanes is not None:
        rows = total // lanes
        max_rows = max(_ROW_ALIGN, _TARGET_BLOCK_BYTES // (lanes * itemsize))
        if rows <= _ROW_ALIGN:
            tm = rows  # full-dim block (allowed even if not tile-aligned)
        elif rows <= max_rows:
            # Whole tensor fits in one ~2 MiB block: split into 2 blocks so both
            # v7x TensorCores get a grid step (harmless on single-TC v5e/v6e).
            tm = pl.cdiv(pl.cdiv(rows, 2), _ROW_ALIGN) * _ROW_ALIGN
        else:
            tm = max_rows
        x2d = xf.reshape(rows, lanes)
        grid = (pl.cdiv(rows, tm),)  # last block may be ragged -> masked writes
        out = pl.pallas_call(
            _h_swish_kernel,
            out_shape=jax.ShapeDtypeStruct(x2d.shape, dtype),
            grid_spec=pl.GridSpec(
                grid=grid,
                in_specs=[pl.BlockSpec((tm, lanes), lambda i: (i, 0))],
                out_specs=pl.BlockSpec((tm, lanes), lambda i: (i, 0)),
            ),
            compiler_params=compiler_params,
        )(x2d)
        return out.reshape(orig_shape)

    # Fallback: element count not a multiple of 128 -> flat 1-D blocks over the
    # unmodified array; ragged final block is masked. Still no pad / no slice.
    chunk = max(128, (_TARGET_BLOCK_BYTES // itemsize) // 128 * 128)
    if total <= chunk:
        chunk = total  # single full-extent block
    grid = (pl.cdiv(total, chunk),)
    out = pl.pallas_call(
        _h_swish_kernel,
        out_shape=jax.ShapeDtypeStruct(xf.shape, dtype),
        grid_spec=pl.GridSpec(
            grid=grid,
            in_specs=[pl.BlockSpec((chunk,), lambda i: (i,))],
            out_specs=pl.BlockSpec((chunk,), lambda i: (i,)),
        ),
        compiler_params=compiler_params,
    )(xf)
    return out.reshape(orig_shape)


if __name__ == "__main__":
    key = jax.random.PRNGKey(0)
    # NCHW, small demo shape
    x = jax.random.normal(key, (2, 4, 16, 16), dtype=jnp.float32) * 4.0

    y = jax.block_until_ready(h_swish(x))

    # Reference in plain JAX (matches torch: x * relu6(x+3)/6)
    y_ref = x * jnp.clip(x + 3.0, 0.0, 6.0) / 6.0
    assert y.shape == x.shape and y.dtype == x.dtype
    assert jnp.allclose(y, y_ref, atol=1e-6, rtol=1e-5)

    print("KERNEL_OK")
</pallas_src>

<mosaic_0001>
module attributes {stable_mosaic.version = 11 : i64} {
  func.func @_h_swish_kernel(%arg0: i32, %arg1: memref<2x1024xf32, #tpu.memory_space<vmem>>, %arg2: memref<2x1024xf32, #tpu.memory_space<vmem>>) attributes {dimension_semantics = [#tpu.dimension_semantics<parallel>], iteration_bounds = array<i64: 1>, scalar_prefetch = 0 : i64, scratch_operands = 0 : i64, tpu.core_type = #tpu.core_type<tc>, window_params = [{transform_indices = @transform_0, window_bounds = array<i64: 2, 1024>}, {transform_indices = @transform_1, window_bounds = array<i64: 2, 1024>}]} {
    %c0 = arith.constant 0 : index
    %c0_0 = arith.constant 0 : index
    %0 = vector.load %arg1[%c0, %c0_0] : memref<2x1024xf32, #tpu.memory_space<vmem>>, vector<2x1024xf32>
    %cst = arith.constant 3.000000e+00 : f32
    %1 = vector.broadcast %cst : f32 to vector<2x1024xf32>
    %2 = arith.addf %0, %1 : vector<2x1024xf32>
    %cst_1 = arith.constant 0.000000e+00 : f32
    %cst_2 = arith.constant 6.000000e+00 : f32
    %3 = vector.broadcast %cst_1 : f32 to vector<2x1024xf32>
    %4 = arith.maximumf %3, %2 : vector<2x1024xf32>
    %5 = vector.broadcast %cst_2 : f32 to vector<2x1024xf32>
    %6 = arith.minimumf %5, %4 : vector<2x1024xf32>
    %7 = arith.mulf %0, %6 : vector<2x1024xf32>
    %cst_3 = arith.constant 0.166666672 : f32
    %8 = vector.broadcast %cst_3 : f32 to vector<2x1024xf32>
    %9 = arith.mulf %7, %8 : vector<2x1024xf32>
    %c0_4 = arith.constant 0 : index
    %c0_5 = arith.constant 0 : index
    %10 = vector.load %arg2[%c0_4, %c0_5] : memref<2x1024xf32, #tpu.memory_space<vmem>>, vector<2x1024xf32>
    tpu.vector_store %arg2[%c0_4, %c0_5], %9 {strides = array<i32>} : memref<2x1024xf32, #tpu.memory_space<vmem>>, vector<2x1024xf32>,
    return
  }
  func.func @transform_0(%arg0: i32) -> (i32, i32) {
    %c0_i32 = arith.constant 0 : i32
    %c0_i32_0 = arith.constant 0 : i32
    return %arg0, %c0_i32 : i32, i32
  }
  func.func @transform_1(%arg0: i32) -> (i32, i32) {
    %c0_i32 = arith.constant 0 : i32
    %c0_i32_0 = arith.constant 0 : i32
    return %arg0, %c0_i32 : i32, i32
  }
}

</mosaic_0001>

<bundles_post_ra>
// kernel: tpu_custom_call.1
= control target key start
LH: loop header
LB: loop body
LE: loop exit
PB: predicated region body
PF: predicated region fallthrough
CT: control target
= control target key end

     0   :  { %6 = vsyncpa [#allocation3], 0  ;;  %s136_s0 = inlined_call_operand.hbm [shape: f32[2,1024], index: 0, kind: input, shape index: {}]   ;;  %s137_s1 = inlined_call_operand.hbm [shape: f32[2,1024], index: 1, kind: output, shape index: {}]  }
   0x1   :  { %7 = vsyncpa [#allocation4], 0  ;;  %s100_s6 = smov [#allocation2]   ;;  %s52_s10 = scalar_lea.hbm %s136_s0, 256 }
   0x2   :  { %s14_s7 = sshll.u32 %s100_s6, 4  ;;  %p53_p0 = scmp.ne.s32.totalorder %s136_s0, %s52_s10  ;;  %s15_s7 = int_to_ptr.vmem [resolvable:$true] %s14_s7 }
   0x3   :  { %p56_p1 = scmp.lt.u32.totalorder %s52_s10, %s136_s0 }
   0x5   :  { %p58_p2 = pnand %p56_p1, %p53_p0 }
   0x7   :  { %61 = shalt.err (!%p58_p2)
}
   0x8   :  { %s62_s15 = scalar_lea.vmem %s15_s7, 256  ;;  %p67_p4 = scmp.lt.s32.totalorder %s15_s7, %s15_s7 }
   0x9   :  { %p63_p3 = scmp.ne.s32.totalorder %s15_s7, %s62_s15  ;;  %p68_p5 = scmp.lt.s32.totalorder %s62_s15, %s62_s15 }
   0xb   :  { %p69_p6 = por %p68_p5, %p67_p4 }
   0xd   :  { %p70_p7 = pnand %p69_p6, %p63_p3 }
   0xf   :  { %73 = shalt.err (!%p70_p7)
}
  0x10   :  { %17 = dma.hbm_to_vmem [thread:$0]  %s136_s0, 256, %s15_s7, [#allocation3]  }
  0x11   :  { %96 = dma.done.wait [#allocation3], 256  }
  0x12   :  { %97 = vsyncadd [#allocation3], 4294967040  ;;  %v21_v0 = vld [vmem:[#allocation2] sm:$0xff]  ;;  %v22_v1 = vld [vmem:[#allocation2 + $0x8] sm:$0xff]  ;;  %s101_s18 = smov [#allocation5]  }
  0x13   :  { %v23_v2 = vadd.f32 3.0, %v21_v0  ;;  %v24_v3 = vadd.f32 3.0, %v22_v1  ;;  %s41_s19 = sshll.u32 %s101_s18, 4  ;;  %s42_s19 = int_to_ptr.vmem [resolvable:$true] %s41_s19 }
  0x14   :  { %s74_s0 = scalar_lea.vmem %s42_s19, 256  ;;  %p79_p9 = scmp.lt.s32.totalorder %s42_s19, %s42_s19 }
  0x15   :  { %v25_v4 = vmax.f32 %v23_v2, 0.0  ;;  %v26_v5 = vmax.f32 %v24_v3, 0.0  ;;  %p75_p8 = scmp.ne.s32.totalorder %s42_s19, %s74_s0  ;;  %p80_p10 = scmp.lt.s32.totalorder %s74_s0, %s74_s0 }
  0x17   :  { %v27_v6 = vmin.f32 %v25_v4, 6.0  ;;  %v28_v7 = vmin.f32 %v26_v5, 6.0  ;;  %p81_p11 = por %p80_p10, %p79_p9 }
  0x19   :  { %v29_v8 = vmul.f32 %v27_v6, %v21_v0  ;;  %v30_v9 = vmul.f32 %v28_v7, %v22_v1  ;;  %p82_p12 = pnand %p81_p11, %p75_p8 }
  0x1b   :  { %v31_v10 = vmul.f32 0.16666667, %v29_v8  ;;  %v32_v11 = vmul.f32 0.16666667, %v30_v9 }
  0x1d   :  { %33 = vst [vmem:[#allocation5] sm:$0xff] %v31_v10  ;;  %34 = vst [vmem:[#allocation5 + $0x8] sm:$0xff] %v32_v11 }
  0x1e   :  { %85 = shalt.err (!%p82_p12)
}
  0x1f   :  { %s86_s22 = scalar_lea.hbm %s137_s1, 256 }
  0x20   :  { %p87_p13 = scmp.ne.s32.totalorder %s137_s1, %s86_s22  ;;  %p90_p0 = scmp.lt.u32.totalorder %s86_s22, %s137_s1 }
  0x22   :  { %p92_p1 = pnand %p90_p0, %p87_p13 }
  0x24   :  { %95 = shalt.err (!%p92_p1)
}
  0x25   :  { %44 = dma.vmem_to_hbm [thread:$0]  %s42_s19, 256, %s137_s1, [#allocation4]  }
  0x26   :  { %98 = dma.done.wait [#allocation4], 256  }
  0x27   :  { %99 = vsyncadd [#allocation4], 4294967040 }
  0x28   :  { %48 = vsyncpa [#allocation3], 1 }
  0x29   :  { %49 = vsyncpa [#allocation4], 1 }

</bundles_post_ra>
